<compile_context>
chip_gen: v6e
topology: v6e:2x2x1
jax: 0.10.0
libtpu: 0.0.40
codegen_flags: <defaults>
</compile_context>

<pallas_src>
import jax
import jax.numpy as jnp
from jax import lax
from jax.experimental import pallas as pl
from jax.experimental.pallas import tpu as pltpu

BN_EPS = 1e-5
LEAKY_SLOPE = 0.01      # F.leaky_relu default negative_slope
TILE_N_MAX = 4096       # rows per grid step; fits comfortably in v7x's 64 MiB VMEM


def encoder_tile_kernel(x_ref, w1_ref, b1_ref, w2_ref, o_ref):
    """One (TILE_N, dimX) row tile: (BN-folded Linear1)+leaky_relu -> (scale-folded Linear2)."""
    h = jnp.dot(x_ref[...], w1_ref[...], preferred_element_type=jnp.float32)
    h = h + b1_ref[...]
    h = jnp.where(h >= 0, h, LEAKY_SLOPE * h)
    y = jnp.dot(h, w2_ref[...], preferred_element_type=jnp.float32)
    o_ref[...] = y.astype(o_ref.dtype)


def _round_up(v, m):
    return (v + m - 1) // m * m


def encoder_forward(x, params):
    """x: (..., dimX) float32.  params: dict of jnp arrays (see init_encoder_params)."""
    gamma, beta = params["bn_gamma"], params["bn_beta"]
    w1, b1 = params["w1"], params["b1"]
    w2 = params["w2"]
    scale = params["output_scale"]

    dim_x = x.shape[-1]
    dim_h = w1.shape[1]
    dim_y = w2.shape[1]
    lead = x.shape[:-1]

    x2d = x.reshape(-1, dim_x).astype(jnp.float32)     # like .view(-1, dimX)
    n = x2d.shape[0]

    # --- BatchNorm1d batch statistics (training mode, biased variance), hoisted
    # out of the kernel so the N-tiled kernel stays embarrassingly parallel. ---
    mean = jnp.mean(x2d, axis=0)                       # (dimX,)
    var = jnp.mean(jnp.square(x2d - mean), axis=0)     # biased variance
    inv_std = lax.rsqrt(var + BN_EPS)

    # --- Fold BN (stats + affine) into Linear1 and output_scale into Linear2 ---
    bn_scale = gamma * inv_std                         # (dimX,)
    w1f = bn_scale[:, None] * w1                       # (dimX, dimH)
    b1f = b1 + (beta - mean * bn_scale) @ w1           # (dimH,)
    w2f = w2 * scale[None, :]                          # (dimH, dimY)
    b1f2 = b1f.reshape(1, dim_h)

    # --- Tile over N (multiple of 8 rows for f32 sublanes); pad tail rows ---
    tile_n = min(TILE_N_MAX, _round_up(n, 8))
    n_pad = _round_up(n, tile_n)
    if n_pad != n:
        x2d = jnp.pad(x2d, ((0, n_pad - n), (0, 0)))
    grid = (n_pad // tile_n,)

    cost = pl.CostEstimate(
        flops=2 * n_pad * (dim_x * dim_h + dim_h * dim_y),
        transcendentals=0,
        bytes_accessed=n_pad * (dim_x + dim_y) * 4
        + (dim_x * dim_h + dim_h + dim_h * dim_y) * 4,
    )

    # Double-buffered in/out tiles + resident weights, with generous slack.
    tile_bytes = 2 * tile_n * (dim_x + dim_y) * 4
    weight_bytes = (dim_x * dim_h + dim_h + dim_h * dim_y) * 4
    vmem_limit = int(max(16 << 20, 4 * (tile_bytes + weight_bytes)))

    out2d = pl.pallas_call(
        encoder_tile_kernel,
        out_shape=jax.ShapeDtypeStruct((n_pad, dim_y), x.dtype),
        grid_spec=pltpu.PrefetchScalarGridSpec(
            num_scalar_prefetch=0,
            grid=grid,
            in_specs=[
                pl.BlockSpec((tile_n, dim_x), lambda i: (i, 0)),  # x row tile
                pl.BlockSpec((dim_x, dim_h), lambda i: (0, 0)),   # folded W1 (resident)
                pl.BlockSpec((1, dim_h), lambda i: (0, 0)),       # folded b1 (resident)
                pl.BlockSpec((dim_h, dim_y), lambda i: (0, 0)),   # folded W2 (resident)
            ],
            out_specs=pl.BlockSpec((tile_n, dim_y), lambda i: (i, 0)),
        ),
        compiler_params=pltpu.CompilerParams(
            dimension_semantics=("parallel",),
            vmem_limit_bytes=vmem_limit,
        ),
        cost_estimate=cost,
    )(x2d, w1f, b1f2, w2f)

    if n_pad != n:
        out2d = out2d[:n]
    return out2d.reshape(*lead, dim_y)


def init_encoder_params(key, shape):
    """Synthetic init matching the PyTorch module's parameter shapes.

    shape = [dimX, hidden, dimY]; last Linear has no bias; BN affine starts at
    identity (gamma=1, beta=0); output_scale starts at ones — exactly as in
    Encoder.__init__.  Linear weights use a uniform fan-in init (stand-in for
    kaiming-uniform; exact init distribution is irrelevant for the kernel).
    """
    dim_x, dim_h, dim_y = shape
    k1, k2, k3 = jax.random.split(key, 3)
    bound1 = 1.0 / jnp.sqrt(dim_x)
    bound2 = 1.0 / jnp.sqrt(dim_h)
    return {
        "bn_gamma": jnp.ones((dim_x,), jnp.float32),
        "bn_beta": jnp.zeros((dim_x,), jnp.float32),
        # stored as (in, out): kernel does x @ W, equal to x @ W_torch.T
        "w1": jax.random.uniform(k1, (dim_x, dim_h), jnp.float32, -bound1, bound1),
        "b1": jax.random.uniform(k2, (dim_h,), jnp.float32, -bound1, bound1),
        "w2": jax.random.uniform(k3, (dim_h, dim_y), jnp.float32, -bound2, bound2),
        "output_scale": jnp.ones((dim_y,), jnp.float32),
    }


def encoder_reference(x, params):
    """Pure-JAX reference of the same forward pass (for correctness check)."""
    dim_x = x.shape[-1]
    lead = x.shape[:-1]
    x2d = x.reshape(-1, dim_x).astype(jnp.float32)
    mean = jnp.mean(x2d, axis=0, keepdims=True)
    var = jnp.mean((x2d - mean) ** 2, axis=0, keepdims=True)
    xh = (x2d - mean) / jnp.sqrt(var + BN_EPS)
    xh = xh * params["bn_gamma"] + params["bn_beta"]
    h = xh @ params["w1"] + params["b1"]
    h = jnp.where(h >= 0, h, LEAKY_SLOPE * h)
    y = h @ params["w2"]
    y = y * params["output_scale"]
    return y.reshape(*lead, -1)


if __name__ == "__main__":
    # Encoder config: lift dimX=8 -> hidden=32 -> dimY=64
    shape = [8, 32, 64]

    key = jax.random.PRNGKey(0)
    k_params, k_x = jax.random.split(key)
    params = init_encoder_params(k_params, shape)

    # input x: (batch=2, seq=8, dimX=8), matching the (N, T, D) path of the module
    x = jax.random.normal(k_x, (2, 8, 8), jnp.float32)

    y = encoder_forward(x, params)
    y = jax.block_until_ready(y)

    y_ref = encoder_reference(x, params)
    assert y.shape == (2, 8, 64), y.shape
    assert jnp.max(jnp.abs(y - y_ref)) < 1e-4

    print("KERNEL_OK")
</pallas_src>

<mosaic_0001>
module attributes {stable_mosaic.version = 11 : i64} {
  func.func @encoder_tile_kernel(%arg0: i32, %arg1: memref<16x8xf32, #tpu.memory_space<vmem>>, %arg2: memref<8x32xf32, #tpu.memory_space<vmem>>, %arg3: memref<1x32xf32, #tpu.memory_space<vmem>>, %arg4: memref<32x64xf32, #tpu.memory_space<vmem>>, %arg5: memref<16x64xf32, #tpu.memory_space<vmem>>) attributes {dimension_semantics = [#tpu.dimension_semantics<parallel>], iteration_bounds = array<i64: 1>, scalar_prefetch = 0 : i64, scratch_operands = 0 : i64, tpu.core_type = #tpu.core_type<tc>, window_params = [{transform_indices = @transform_0, window_bounds = array<i64: 16, 8>}, {pipeline_mode = #tpu.pipeline_mode<synchronous>, transform_indices = @transform_1, window_bounds = array<i64: 8, 32>}, {pipeline_mode = #tpu.pipeline_mode<synchronous>, transform_indices = @transform_2, window_bounds = array<i64: 1, 32>}, {pipeline_mode = #tpu.pipeline_mode<synchronous>, transform_indices = @transform_3, window_bounds = array<i64: 32, 64>}, {transform_indices = @transform_4, window_bounds = array<i64: 16, 64>}]} {
    %c0 = arith.constant 0 : index
    %c0_0 = arith.constant 0 : index
    %0 = vector.load %arg1[%c0, %c0_0] : memref<16x8xf32, #tpu.memory_space<vmem>>, vector<16x8xf32>
    %c0_1 = arith.constant 0 : index
    %c0_2 = arith.constant 0 : index
    %1 = vector.load %arg2[%c0_1, %c0_2] : memref<8x32xf32, #tpu.memory_space<vmem>>, vector<8x32xf32>
    %cst = arith.constant dense<0.000000e+00> : vector<16x32xf32>
    %2 = tpu.matmul %0, %1, %cst {dimension_numbers = #tpu.dot_dimension_numbers<[1], [0], [0], [1], [0, 0, 1, 1], [], []>} : vector<16x8xf32>, vector<8x32xf32>, vector<16x32xf32> -> vector<16x32xf32>
    %c0_3 = arith.constant 0 : index
    %c0_4 = arith.constant 0 : index
    %3 = vector.load %arg3[%c0_3, %c0_4] : memref<1x32xf32, #tpu.memory_space<vmem>>, vector<1x32xf32>
    %4 = vector.broadcast %3 : vector<1x32xf32> to vector<16x32xf32>
    %5 = arith.addf %2, %4 : vector<16x32xf32>
    %cst_5 = arith.constant 0.000000e+00 : f32
    %6 = vector.broadcast %cst_5 : f32 to vector<16x32xf32>
    %7 = arith.cmpf oge, %5, %6 : vector<16x32xf32>
    %cst_6 = arith.constant 0.00999999977 : f32
    %8 = vector.broadcast %cst_6 : f32 to vector<16x32xf32>
    %9 = arith.mulf %8, %5 : vector<16x32xf32>
    %10 = arith.select %7, %5, %9 : vector<16x32xi1>, vector<16x32xf32>
    %c0_7 = arith.constant 0 : index
    %c0_8 = arith.constant 0 : index
    %11 = vector.load %arg4[%c0_7, %c0_8] : memref<32x64xf32, #tpu.memory_space<vmem>>, vector<32x64xf32>
    %cst_9 = arith.constant dense<0.000000e+00> : vector<16x64xf32>
    %12 = tpu.matmul %10, %11, %cst_9 {dimension_numbers = #tpu.dot_dimension_numbers<[1], [0], [0], [1], [0, 0, 1, 1], [], []>} : vector<16x32xf32>, vector<32x64xf32>, vector<16x64xf32> -> vector<16x64xf32>
    %c0_10 = arith.constant 0 : index
    %c0_11 = arith.constant 0 : index
    %13 = vector.load %arg5[%c0_10, %c0_11] : memref<16x64xf32, #tpu.memory_space<vmem>>, vector<16x64xf32>
    tpu.vector_store %arg5[%c0_10, %c0_11], %12 {strides = array<i32>} : memref<16x64xf32, #tpu.memory_space<vmem>>, vector<16x64xf32>,
    return
  }
  func.func @transform_0(%arg0: i32) -> (i32, i32) {
    %c0_i32 = arith.constant 0 : i32
    %c0_i32_0 = arith.constant 0 : i32
    return %arg0, %c0_i32 : i32, i32
  }
  func.func @transform_1(%arg0: i32) -> (i32, i32) {
    %c0_i32 = arith.constant 0 : i32
    %c0_i32_0 = arith.constant 0 : i32
    %c0_i32_1 = arith.constant 0 : i32
    return %c0_i32, %c0_i32_0 : i32, i32
  }
  func.func @transform_2(%arg0: i32) -> (i32, i32) {
    %c0_i32 = arith.constant 0 : i32
    %c0_i32_0 = arith.constant 0 : i32
    %c0_i32_1 = arith.constant 0 : i32
    return %c0_i32, %c0_i32_0 : i32, i32
  }
  func.func @transform_3(%arg0: i32) -> (i32, i32) {
    %c0_i32 = arith.constant 0 : i32
    %c0_i32_0 = arith.constant 0 : i32
    %c0_i32_1 = arith.constant 0 : i32
    return %c0_i32, %c0_i32_0 : i32, i32
  }
  func.func @transform_4(%arg0: i32) -> (i32, i32) {
    %c0_i32 = arith.constant 0 : i32
    %c0_i32_0 = arith.constant 0 : i32
    return %arg0, %c0_i32 : i32, i32
  }
}

</mosaic_0001>

<bundles_post_ra>
// kernel: tpu_custom_call.1
= control target key start
LH: loop header
LB: loop body
LE: loop exit
PB: predicated region body
PF: predicated region fallthrough
CT: control target
= control target key end

     0   :  { %9 = vsyncpa [#allocation3], 0  ;;  %s367_s0 = inlined_call_operand.vmem [shape: f32[16,8], index: 0, kind: input, shape index: {}]   ;;  %s368_s1 = inlined_call_operand.vmem [shape: f32[8,32], index: 1, kind: input, shape index: {}]   ;;  %s369_s2 = inlined_call_operand.vmem [shape: f32[1,32], index: 2, kind: input, shape index: {}]   ;;  %s370_s3 = inlined_call_operand.hbm [shape: f32[32,64], index: 3, kind: input, shape index: {}]   ;;  %s371_s4 = inlined_call_operand.hbm [shape: f32[16,64], index: 4, kind: output, shape index: {}]  }
   0x1   :  { %10 = vsyncpa [#allocation4], 0  ;;  %s314_s15 = smov [#allocation2]  }
   0x2   :  { %s22_s16 = sshll.u32 %s314_s15, 4  ;;  %s23_s16 = int_to_ptr.vmem [resolvable:$true] %s22_s16 }
   0x3   :  { %s278_s17 = scalar_lea.vmem %s23_s16, 512  ;;  %p283_p1 = scmp.lt.s32.totalorder %s23_s16, %s23_s16 }
   0x4   :  { %p279_p0 = scmp.ne.s32.totalorder %s23_s16, %s278_s17  ;;  %p284_p2 = scmp.lt.s32.totalorder %s278_s17, %s278_s17 }
   0x6   :  { %p285_p3 = por %p284_p2, %p283_p1 }
   0x8   :  { %p286_p4 = pnand %p285_p3, %p279_p0 }
   0xa   :  { %289 = shalt.err (!%p286_p4)
}
   0xb   :  { %s315_s18 = smov 128   ;;  %s316_s19 = smov 8  }
   0xc   :  { %28 = dma.hbm_to_vmem [thread:$0]  %s370_s3, 512, %s23_s16, [#allocation3], %s315_s18, %s315_s18, %s316_s19  }
   0xd   :  { %310 = dma.done.wait [#allocation3], 512  }
   0xe   :  { %311 = vsyncadd [#allocation3], 4294966784  ;;  %vm42_vm0 = vcmask 64512   ;;  %v34_v0 = vld [vmem:[%s368_s1] sm:$0xff]  ;;  %v33_v2 = vld [vmem:[%s367_s0 + $0x8] sm:$0xff]  ;;  %vm134_vm3 = vcmask 261120  }
   0xf   :  { %v32_v1 = vld [vmem:[%s367_s0] sm:$0xff]  ;;  %250 = vmatprep.subr.mxu0 %v34_v0  ;;  %v133_v3 = vld [vmem:[#allocation2 + $0x18] sm:$0xff]  ;;  %v132_v4 = vld [vmem:[#allocation2 + $0x10] sm:$0xff]  ;;  %vm216_vm4 = vcmask 523264   ;;  %s317_s0 = smov [#allocation5]  }
  0x10   :  { %252 = vmatprep.mubr.msk.f32.mxu0 %vm42_vm0, %v32_v1  ;;  %251 = vmatpush3.msra.mxu0 %v34_v0  ;;  %v131_v5 = vld [vmem:[#allocation2 + $0x8] sm:$0xff]  ;;  %v130_v6 = vld [vmem:[#allocation2] sm:$0xff]  ;;  %s224_s28 = sshll.u32 %s317_s0, 4  ;;  %s225_s28 = int_to_ptr.vmem [resolvable:$true] %s224_s28 }
  0x11   :  { %253 = vmatmul.mubr.msk.f32.vlgmr.msra.gmra.mxu0 %vm42_vm0, %v33_v2  ;;  %255 = vmatprep.subr.mxu1 %v133_v3  ;;  %v236_v7 = vld [vmem:[%s369_s2] ss:$0 sm:$0xff]  ;;  %s290_s2 = scalar_lea.vmem %s225_s28, 256  ;;  %p295_p6 = scmp.lt.s32.totalorder %s225_s28, %s225_s28 }
  0x12   :  { %256 = vmatpush3.msra.mxu1 %v133_v3  ;;  %p291_p5 = scmp.ne.s32.totalorder %s225_s28, %s290_s2  ;;  %p296_p7 = scmp.lt.s32.totalorder %s290_s2, %s290_s2 }
  0x13   :  { %257 = vmatprep.subr.mxu1 %v132_v4 }
  0x14   :  { %258 = vmatpush3.msra.mxu1 %v132_v4  ;;  %p297_p8 = por %p296_p7, %p295_p6 }
  0x15   :  { %259 = vmatprep.subr.mxu1 %v131_v5 }
  0x16   :  { %260 = vmatpush3.msra.mxu1 %v131_v5  ;;  %p298_p9 = pnand %p297_p8, %p291_p5 }
  0x17   :  { %261 = vmatprep.subr.mxu1 %v130_v6 }
  0x18   :  { %262 = vmatpush3.msra.mxu1 %v130_v6 }
  0xd1   :  { %v254_v8 = vpop.f32.mrf.mxu0 }
  0xd2   :  { %v121_v9 = vadd.f32 %v254_v8, %v236_v7 }
  0xd3   :  { %v115_v10 = vpop.f32.mrf.mxu0 }
  0xd4   :  { %v116_v11 = vadd.f32 %v236_v7, %v115_v10  ;;  %v127_v12 = vmul.f32 0.01, %v121_v9  ;;  %vm125_vm1 = vcmp.ge.f32.partialorder %v121_v9, 0.0 }
  0xd6   :  { %vm124_vm2 = vcmp.ge.f32.partialorder %v116_v11, 0.0  ;;  %v126_v13 = vmul.f32 0.01, %v116_v11  ;;  %v129_v15 = vsel %vm125_vm1, %v121_v9, %v127_v12 }
  0xd8   :  { %v128_v14 = vsel %vm124_vm2, %v116_v11, %v126_v13 }
  0xd9   :  { %263 = vmatprep.mubr.msk.f32.mxu1 %vm134_vm3, %v128_v14 }
  0xda   :  { %264 = vmatmul.mubr.msk.f32.vlgmr.msra.gmra.mxu1 %vm134_vm3, %v129_v15 }
 0x19a   :  { %v265_v16 = vpop.f32.mrf.mxu1 }
 0x19b   :  { %218 = vst.msk [vmem:[#allocation5 + $0x8] sm:$0xff] %vm216_vm4, %v265_v16 }
 0x19c   :  { %v207_v17 = vpop.f32.mrf.mxu1 }
 0x19d   :  { %217 = vst.msk [vmem:[#allocation5] sm:$0xff] %vm216_vm4, %v207_v17 }
 0x19e   :  { %301 = shalt.err (!%p298_p9)
}
 0x19f   :  { %230 = dma.vmem_to_hbm [thread:$0]  %s225_s28, 256, %s371_s4, [#allocation4], %s315_s18, %s315_s18, %s316_s19  }
 0x1a0   :  { %312 = dma.done.wait [#allocation4], 256  }
 0x1a1   :  { %313 = vsyncadd [#allocation4], 4294967040 }
 0x1a2   :  { %234 = vsyncpa [#allocation3], 1 }
 0x1a3   :  { %235 = vsyncpa [#allocation4], 1 }

</bundles_post_ra>
